<compile_context>
chip_gen: v6e
topology: v6e:2x2x1
jax: 0.10.0
libtpu: 0.0.40
codegen_flags: <defaults>
</compile_context>

<pallas_src>
import functools

import jax
import jax.numpy as jnp
from jax.experimental import pallas as pl
from jax.experimental.pallas import tpu as pltpu


def _temporal_block_kernel(*refs, K, dilation, pad, L, has_downsample):
    if has_downsample:
        (x_ref, w1_ref, t1_ref, w2_ref, t2_ref, wd_ref, bd_ref,
         out_ref, hpad_ref) = refs
    else:
        x_ref, w1_ref, t1_ref, w2_ref, t2_ref, out_ref, hpad_ref = refs
        wd_ref = bd_ref = None

    d = dilation
    bf16 = jnp.bfloat16
    cin = x_ref.shape[1]

    x = x_ref[0]                                              # (Cin, Lp) bf16

    # ---- conv1: stack the K dilated taps along the contraction axis (bf16),
    #      one MXU matmul: (Cout, K*Cin) @ (K*Cin, L) -> f32 ----
    xs = jnp.concatenate([x[:, k * d:k * d + L] for k in range(K)], axis=0)
    h = jnp.dot(w1_ref[...], xs, preferred_element_type=jnp.float32)
    h = jnp.maximum(h + t1_ref[...], 0.0).astype(bf16)        # fused bias+BN1, ReLU
    # dropout1: identity (eval mode)

    # ---- conv2: write h into a zero-padded VMEM scratch, slice K taps ----
    if pad > 0:
        z = jnp.zeros((hpad_ref.shape[0], pad), bf16)
        hpad_ref[:, :pad] = z
        hpad_ref[:, pad + L:] = z
    hpad_ref[:, pad:pad + L] = h
    hs = jnp.concatenate(
        [hpad_ref[:, k * d:k * d + L] for k in range(K)], axis=0)
    o = jnp.dot(w2_ref[...], hs, preferred_element_type=jnp.float32)
    o = jnp.maximum(o + t2_ref[...], 0.0)                     # fused bias+BN2, ReLU
    # dropout2: identity (eval mode)

    # ---- residual branch: for odd K the unpadded input window x[:, pad:pad+L]
    #      is exactly the middle tap already inside xs (free reuse) ----
    if K % 2 == 1:
        m = (K - 1) // 2
        xr = xs[m * cin:(m + 1) * cin, :]                     # (Cin, L) bf16
    else:
        xr = x[:, pad:pad + L]
    if has_downsample:
        res = jnp.dot(wd_ref[...], xr, preferred_element_type=jnp.float32)
        res = res + bd_ref[...]
    else:
        res = xr.astype(jnp.float32)

    out_ref[0] = jnp.maximum(o + res, 0.0).astype(out_ref.dtype)


def _vmem_limit_bytes():
    """Generation-aware VMEM limit: ~3/4 of physical, clamped to [32, 100] MiB."""
    try:
        cap = int(pltpu.get_tpu_info().vmem_capacity_bytes)
    except Exception:
        cap = 64 * 1024 * 1024   # conservative (v7x-sized) fallback
    return int(min(100 * 1024 * 1024, max(32 * 1024 * 1024, cap * 3 // 4)))


def temporal_block_forward(x, params, *, kernel_size, dilation, eps=1e-5,
                           out_dtype=jnp.bfloat16):
    """x: (N, Cin, L) float32; params: PyTorch-layout parameter dict.
    Returns (N, Cout, L) in `out_dtype` (eval-mode TemporalBlock forward)."""
    N, Cin, L = x.shape
    K = kernel_size
    pad = dilation * (K - 1) // 2
    # The PyTorch module only adds (out + res) when the conv is length
    # preserving, i.e. dilation*(K-1) even; mirror that restriction explicitly.
    assert dilation * (K - 1) == 2 * pad, (
        "dilation*(kernel_size-1) must be even for a length-preserving block")
    Lp = L + 2 * pad

    Cout = params["w1"].shape[0]
    has_downsample = Cin != Cout

    def fold(w_t, b, gamma, beta, mean, var):
        # Fold eval-mode BN (scale s, shift) and the conv bias into the weights.
        s = gamma / jnp.sqrt(var + eps)
        w = w_t * s[:, None, None]                               # (Cout, Ci, K)
        w = jnp.transpose(w, (0, 2, 1)).reshape(w.shape[0], -1)  # (Cout, K*Ci)
        shift = s * (b - mean) + beta
        return w.astype(jnp.bfloat16), shift.reshape(-1, 1).astype(jnp.float32)

    w1, t1 = fold(params["w1"], params["b1"],
                  params["g1"], params["be1"], params["m1"], params["v1"])
    w2, t2 = fold(params["w2"], params["b2"],
                  params["g2"], params["be2"], params["m2"], params["v2"])

    # Pre-pad once and cast to bf16 (half the HBM DMA bytes; MXU is bf16-native,
    # accumulation stays f32 inside the kernel).
    x_pad = jnp.pad(x, ((0, 0), (0, 0), (pad, pad))).astype(jnp.bfloat16)

    rep2 = lambda r, c: pl.BlockSpec((r, c), lambda n: (0, 0))
    in_specs = [
        pl.BlockSpec((1, Cin, Lp), lambda n: (n, 0, 0)),   # x_pad (one sample)
        rep2(Cout, K * Cin),                               # w1 (BN folded)
        rep2(Cout, 1),                                     # shift1
        rep2(Cout, K * Cout),                              # w2 (BN folded)
        rep2(Cout, 1),                                     # shift2
    ]
    args = [x_pad, w1, t1, w2, t2]
    if has_downsample:
        wd = params["wd"][:, :, 0].astype(jnp.bfloat16)    # (Cout, Cin)
        bd = params["bd"].reshape(-1, 1).astype(jnp.float32)
        in_specs += [rep2(Cout, Cin), rep2(Cout, 1)]
        args += [wd, bd]

    kernel = functools.partial(
        _temporal_block_kernel,
        K=K, dilation=dilation, pad=pad, L=L, has_downsample=has_downsample)

    return pl.pallas_call(
        kernel,
        out_shape=jax.ShapeDtypeStruct((N, Cout, L), out_dtype),
        grid_spec=pltpu.PrefetchScalarGridSpec(
            num_scalar_prefetch=0,
            grid=(N,),
            in_specs=in_specs,
            out_specs=pl.BlockSpec((1, Cout, L), lambda n: (n, 0, 0)),
            scratch_shapes=[pltpu.VMEM((Cout, Lp), jnp.bfloat16)],
        ),
        compiler_params=pltpu.CompilerParams(
            dimension_semantics=("parallel",),
            vmem_limit_bytes=_vmem_limit_bytes()),
    )(*args)


def init_params(key, in_channels, out_channels, kernel_size):
    """PyTorch-layout params. BN stats are non-default so aliased/swapped BN
    would be caught by the reference check."""
    K = kernel_size
    ks = jax.random.split(key, 14)

    def conv_init(kw, kb, cout, cin, ksz):
        bound = 1.0 / jnp.sqrt(cin * ksz)
        w = jax.random.uniform(kw, (cout, cin, ksz), jnp.float32, -bound, bound)
        b = jax.random.uniform(kb, (cout,), jnp.float32, -bound, bound)
        return w, b

    def bn_init(kg, kb, km, kv, c):
        gamma = jax.random.uniform(kg, (c,), jnp.float32, 0.5, 1.5)
        beta = jax.random.uniform(kb, (c,), jnp.float32, -0.5, 0.5)
        mean = jax.random.uniform(km, (c,), jnp.float32, -0.5, 0.5)
        var = jax.random.uniform(kv, (c,), jnp.float32, 0.5, 1.5)
        return gamma, beta, mean, var

    w1, b1 = conv_init(ks[0], ks[1], out_channels, in_channels, K)
    w2, b2 = conv_init(ks[2], ks[3], out_channels, out_channels, K)
    wd, bd = conv_init(ks[4], ks[5], out_channels, in_channels, 1)
    g1, be1, m1, v1 = bn_init(ks[6], ks[7], ks[8], ks[9], out_channels)
    g2, be2, m2, v2 = bn_init(ks[10], ks[11], ks[12], ks[13], out_channels)

    return dict(w1=w1, b1=b1, g1=g1, be1=be1, m1=m1, v1=v1,
                w2=w2, b2=b2, g2=g2, be2=be2, m2=m2, v2=v2,
                wd=wd, bd=bd)


def reference_forward(x, p, *, kernel_size, dilation, eps=1e-5):
    """Pure-JAX reference mirroring the PyTorch forward (eval mode)."""
    pad = dilation * (kernel_size - 1) // 2
    dn = ("NCH", "OIH", "NCH")

    def conv(x, w, b, dil, pd):
        y = jax.lax.conv_general_dilated(
            x, w, window_strides=(1,), padding=[(pd, pd)],
            rhs_dilation=(dil,), dimension_numbers=dn,
            precision=jax.lax.Precision.HIGHEST)
        return y + b[None, :, None]

    def bn(x, gamma, beta, mean, var):
        s = gamma / jnp.sqrt(var + eps)
        return x * s[None, :, None] + (beta - mean * s)[None, :, None]

    out = jax.nn.relu(bn(conv(x, p["w1"], p["b1"], dilation, pad),
                         p["g1"], p["be1"], p["m1"], p["v1"]))
    out = jax.nn.relu(bn(conv(out, p["w2"], p["b2"], dilation, pad),
                         p["g2"], p["be2"], p["m2"], p["v2"]))
    cin, cout = x.shape[1], p["w1"].shape[0]
    res = x if cin == cout else conv(x, p["wd"], p["bd"], 1, 0)
    return jax.nn.relu(out + res)


if __name__ == "__main__":
    N, Cin, Cout, L = 2, 4, 8, 16
    kernel_size, dilation, dropout = 3, 1, 0.1   # dropout unused in eval mode

    key = jax.random.PRNGKey(0)
    kx, kp = jax.random.split(key)
    x = jax.random.normal(kx, (N, Cin, L), jnp.float32)
    params = init_params(kp, Cin, Cout, kernel_size)

    y = temporal_block_forward(x, params, kernel_size=kernel_size,
                               dilation=dilation)
    y = jax.block_until_ready(y)
    y_f32 = jnp.asarray(y, jnp.float32)

    # The reference sees the same bf16-rounded activations the kernel consumes;
    # remaining differences come from bf16 weight storage (folded BN scale) and
    # the bf16 output store.
    x_bf = x.astype(jnp.bfloat16).astype(jnp.float32)
    y_ref = reference_forward(x_bf, params, kernel_size=kernel_size,
                              dilation=dilation)

    assert y.shape == (N, Cout, L)
    err = float(jnp.max(jnp.abs(y_f32 - y_ref)))
    assert jnp.allclose(y_f32, y_ref, atol=7.5e-2, rtol=5e-2), \
        f"max abs err {err}"

    print("KERNEL_OK")
</pallas_src>

<mosaic_0001>
module attributes {stable_mosaic.version = 11 : i64} {
  func.func @_temporal_block_kernel(%arg0: i32, %arg1: memref<1x4x18xbf16, #tpu.memory_space<vmem>>, %arg2: memref<8x12xbf16, #tpu.memory_space<vmem>>, %arg3: memref<8x1xf32, #tpu.memory_space<vmem>>, %arg4: memref<8x24xbf16, #tpu.memory_space<vmem>>, %arg5: memref<8x1xf32, #tpu.memory_space<vmem>>, %arg6: memref<8x4xbf16, #tpu.memory_space<vmem>>, %arg7: memref<8x1xf32, #tpu.memory_space<vmem>>, %arg8: memref<1x8x16xbf16, #tpu.memory_space<vmem>>, %arg9: memref<8x18xbf16, #tpu.memory_space<vmem>>) attributes {dimension_semantics = [#tpu.dimension_semantics<parallel>], iteration_bounds = array<i64: 2>, scalar_prefetch = 0 : i64, scratch_operands = 1 : i64, tpu.core_type = #tpu.core_type<tc>, window_params = [{transform_indices = @transform_0, window_bounds = array<i64: 1, 4, 18>}, {pipeline_mode = #tpu.pipeline_mode<synchronous>, transform_indices = @transform_1, window_bounds = array<i64: 8, 12>}, {pipeline_mode = #tpu.pipeline_mode<synchronous>, transform_indices = @transform_2, window_bounds = array<i64: 8, 1>}, {pipeline_mode = #tpu.pipeline_mode<synchronous>, transform_indices = @transform_3, window_bounds = array<i64: 8, 24>}, {pipeline_mode = #tpu.pipeline_mode<synchronous>, transform_indices = @transform_4, window_bounds = array<i64: 8, 1>}, {pipeline_mode = #tpu.pipeline_mode<synchronous>, transform_indices = @transform_5, window_bounds = array<i64: 8, 4>}, {pipeline_mode = #tpu.pipeline_mode<synchronous>, transform_indices = @transform_6, window_bounds = array<i64: 8, 1>}, {transform_indices = @transform_7, window_bounds = array<i64: 1, 8, 16>}]} {
    %c0 = arith.constant 0 : index
    %c0_0 = arith.constant 0 : index
    %c0_1 = arith.constant 0 : index
    %0 = vector.load %arg1[%c0, %c0_0, %c0_1] : memref<1x4x18xbf16, #tpu.memory_space<vmem>>, vector<1x4x18xbf16>
    %1 = vector.shape_cast %0 : vector<1x4x18xbf16> to vector<4x18xbf16>
    %2 = vector.extract_strided_slice %1 {offsets = [0, 0], sizes = [4, 16], strides = [1, 1]} : vector<4x18xbf16> to vector<4x16xbf16>
    %3 = vector.extract_strided_slice %1 {offsets = [0, 1], sizes = [4, 16], strides = [1, 1]} : vector<4x18xbf16> to vector<4x16xbf16>
    %4 = vector.extract_strided_slice %1 {offsets = [0, 2], sizes = [4, 16], strides = [1, 1]} : vector<4x18xbf16> to vector<4x16xbf16>
    %5 = tpu.concatenate %2, %3, %4 in 0 : vector<4x16xbf16>, vector<4x16xbf16>, vector<4x16xbf16> -> vector<12x16xbf16>
    %c0_2 = arith.constant 0 : index
    %c0_3 = arith.constant 0 : index
    %6 = vector.load %arg2[%c0_2, %c0_3] : memref<8x12xbf16, #tpu.memory_space<vmem>>, vector<8x12xbf16>
    %cst = arith.constant dense<0.000000e+00> : vector<8x16xf32>
    %7 = tpu.matmul %6, %5, %cst {dimension_numbers = #tpu.dot_dimension_numbers<[1], [0], [0], [1], [0, 0, 1, 1], [], []>} : vector<8x12xbf16>, vector<12x16xbf16>, vector<8x16xf32> -> vector<8x16xf32>
    %c0_4 = arith.constant 0 : index
    %c0_5 = arith.constant 0 : index
    %8 = vector.load %arg3[%c0_4, %c0_5] : memref<8x1xf32, #tpu.memory_space<vmem>>, vector<8x1xf32>
    %9 = vector.broadcast %8 : vector<8x1xf32> to vector<8x16xf32>
    %10 = arith.addf %7, %9 : vector<8x16xf32>
    %cst_6 = arith.constant 0.000000e+00 : f32
    %11 = vector.broadcast %cst_6 : f32 to vector<8x16xf32>
    %12 = arith.maximumf %10, %11 : vector<8x16xf32>
    %13 = arith.truncf %12 : vector<8x16xf32> to vector<8x16xbf16>
    %cst_7 = arith.constant 0.000000e+00 : bf16
    %14 = vector.broadcast %cst_7 : bf16 to vector<8x1xbf16>
    %c0_8 = arith.constant 0 : index
    %c0_9 = arith.constant 0 : index
    %15 = vector.load %arg9[%c0_8, %c0_9] : memref<8x18xbf16, #tpu.memory_space<vmem>>, vector<8x1xbf16>
    tpu.vector_store %arg9[%c0_8, %c0_9], %14 {strides = array<i32>} : memref<8x18xbf16, #tpu.memory_space<vmem>>, vector<8x1xbf16>,
    %c0_10 = arith.constant 0 : index
    %c17 = arith.constant 17 : index
    %16 = vector.load %arg9[%c0_10, %c17] : memref<8x18xbf16, #tpu.memory_space<vmem>>, vector<8x1xbf16>
    tpu.vector_store %arg9[%c0_10, %c17], %14 {strides = array<i32>} : memref<8x18xbf16, #tpu.memory_space<vmem>>, vector<8x1xbf16>,
    %c0_11 = arith.constant 0 : index
    %c1 = arith.constant 1 : index
    %17 = vector.load %arg9[%c0_11, %c1] : memref<8x18xbf16, #tpu.memory_space<vmem>>, vector<8x16xbf16>
    tpu.vector_store %arg9[%c0_11, %c1], %13 {strides = array<i32>} : memref<8x18xbf16, #tpu.memory_space<vmem>>, vector<8x16xbf16>,
    %c0_12 = arith.constant 0 : index
    %c0_13 = arith.constant 0 : index
    %18 = vector.load %arg9[%c0_12, %c0_13] : memref<8x18xbf16, #tpu.memory_space<vmem>>, vector<8x16xbf16>
    %c0_14 = arith.constant 0 : index
    %c1_15 = arith.constant 1 : index
    %19 = vector.load %arg9[%c0_14, %c1_15] : memref<8x18xbf16, #tpu.memory_space<vmem>>, vector<8x16xbf16>
    %c0_16 = arith.constant 0 : index
    %c2 = arith.constant 2 : index
    %20 = vector.load %arg9[%c0_16, %c2] : memref<8x18xbf16, #tpu.memory_space<vmem>>, vector<8x16xbf16>
    %21 = tpu.concatenate %18, %19, %20 in 0 : vector<8x16xbf16>, vector<8x16xbf16>, vector<8x16xbf16> -> vector<24x16xbf16>
    %c0_17 = arith.constant 0 : index
    %c0_18 = arith.constant 0 : index
    %22 = vector.load %arg4[%c0_17, %c0_18] : memref<8x24xbf16, #tpu.memory_space<vmem>>, vector<8x24xbf16>
    %cst_19 = arith.constant dense<0.000000e+00> : vector<8x16xf32>
    %23 = tpu.matmul %22, %21, %cst_19 {dimension_numbers = #tpu.dot_dimension_numbers<[1], [0], [0], [1], [0, 0, 1, 1], [], []>} : vector<8x24xbf16>, vector<24x16xbf16>, vector<8x16xf32> -> vector<8x16xf32>
    %c0_20 = arith.constant 0 : index
    %c0_21 = arith.constant 0 : index
    %24 = vector.load %arg5[%c0_20, %c0_21] : memref<8x1xf32, #tpu.memory_space<vmem>>, vector<8x1xf32>
    %25 = vector.broadcast %24 : vector<8x1xf32> to vector<8x16xf32>
    %26 = arith.addf %23, %25 : vector<8x16xf32>
    %cst_22 = arith.constant 0.000000e+00 : f32
    %27 = vector.broadcast %cst_22 : f32 to vector<8x16xf32>
    %28 = arith.maximumf %26, %27 : vector<8x16xf32>
    %29 = vector.extract_strided_slice %5 {offsets = [4, 0], sizes = [4, 16], strides = [1, 1]} : vector<12x16xbf16> to vector<4x16xbf16>
    %c0_23 = arith.constant 0 : index
    %c0_24 = arith.constant 0 : index
    %30 = vector.load %arg6[%c0_23, %c0_24] : memref<8x4xbf16, #tpu.memory_space<vmem>>, vector<8x4xbf16>
    %cst_25 = arith.constant dense<0.000000e+00> : vector<8x16xf32>
    %31 = tpu.matmul %30, %29, %cst_25 {dimension_numbers = #tpu.dot_dimension_numbers<[1], [0], [0], [1], [0, 0, 1, 1], [], []>} : vector<8x4xbf16>, vector<4x16xbf16>, vector<8x16xf32> -> vector<8x16xf32>
    %c0_26 = arith.constant 0 : index
    %c0_27 = arith.constant 0 : index
    %32 = vector.load %arg7[%c0_26, %c0_27] : memref<8x1xf32, #tpu.memory_space<vmem>>, vector<8x1xf32>
    %33 = vector.broadcast %32 : vector<8x1xf32> to vector<8x16xf32>
    %34 = arith.addf %31, %33 : vector<8x16xf32>
    %35 = arith.addf %28, %34 : vector<8x16xf32>
    %cst_28 = arith.constant 0.000000e+00 : f32
    %36 = vector.broadcast %cst_28 : f32 to vector<8x16xf32>
    %37 = arith.maximumf %35, %36 : vector<8x16xf32>
    %38 = arith.truncf %37 : vector<8x16xf32> to vector<8x16xbf16>
    %c0_29 = arith.constant 0 : index
    %c0_30 = arith.constant 0 : index
    %c0_31 = arith.constant 0 : index
    %39 = vector.load %arg8[%c0_29, %c0_30, %c0_31] : memref<1x8x16xbf16, #tpu.memory_space<vmem>>, vector<1x8x16xbf16>
    %40 = vector.shape_cast %39 : vector<1x8x16xbf16> to vector<8x16xbf16>
    %41 = vector.shape_cast %38 : vector<8x16xbf16> to vector<1x8x16xbf16>
    tpu.vector_store %arg8[%c0_29, %c0_30, %c0_31], %41 {strides = array<i32>} : memref<1x8x16xbf16, #tpu.memory_space<vmem>>, vector<1x8x16xbf16>,
    return
  }
  func.func @transform_0(%arg0: i32) -> (i32, i32, i32) {
    %c0_i32 = arith.constant 0 : i32
    %c0_i32_0 = arith.constant 0 : i32
    %c0_i32_1 = arith.constant 0 : i32
    return %arg0, %c0_i32, %c0_i32_0 : i32, i32, i32
  }
  func.func @transform_1(%arg0: i32) -> (i32, i32) {
    %c0_i32 = arith.constant 0 : i32
    %c0_i32_0 = arith.constant 0 : i32
    %c0_i32_1 = arith.constant 0 : i32
    return %c0_i32, %c0_i32_0 : i32, i32
  }
  func.func @transform_2(%arg0: i32) -> (i32, i32) {
    %c0_i32 = arith.constant 0 : i32
    %c0_i32_0 = arith.constant 0 : i32
    %c0_i32_1 = arith.constant 0 : i32
    return %c0_i32, %c0_i32_0 : i32, i32
  }
  func.func @transform_3(%arg0: i32) -> (i32, i32) {
    %c0_i32 = arith.constant 0 : i32
    %c0_i32_0 = arith.constant 0 : i32
    %c0_i32_1 = arith.constant 0 : i32
    return %c0_i32, %c0_i32_0 : i32, i32
  }
  func.func @transform_4(%arg0: i32) -> (i32, i32) {
    %c0_i32 = arith.constant 0 : i32
    %c0_i32_0 = arith.constant 0 : i32
    %c0_i32_1 = arith.constant 0 : i32
    return %c0_i32, %c0_i32_0 : i32, i32
  }
  func.func @transform_5(%arg0: i32) -> (i32, i32) {
    %c0_i32 = arith.constant 0 : i32
    %c0_i32_0 = arith.constant 0 : i32
    %c0_i32_1 = arith.constant 0 : i32
    return %c0_i32, %c0_i32_0 : i32, i32
  }
  func.func @transform_6(%arg0: i32) -> (i32, i32) {
    %c0_i32 = arith.constant 0 : i32
    %c0_i32_0 = arith.constant 0 : i32
    %c0_i32_1 = arith.constant 0 : i32
    return %c0_i32, %c0_i32_0 : i32, i32
  }
  func.func @transform_7(%arg0: i32) -> (i32, i32, i32) {
    %c0_i32 = arith.constant 0 : i32
    %c0_i32_0 = arith.constant 0 : i32
    %c0_i32_1 = arith.constant 0 : i32
    return %arg0, %c0_i32, %c0_i32_0 : i32, i32, i32
  }
}

</mosaic_0001>

<bundles_post_ra>
// kernel: tpu_custom_call.1
= control target key start
LH: loop header
LB: loop body
LE: loop exit
PB: predicated region body
PF: predicated region fallthrough
CT: control target
= control target key end

     0   :  { %12 = vsyncpa [#allocation4], 0  ;;  %s898_s0 = inlined_call_operand.vmem [shape: bf16[2,4,18], index: 0, kind: input, shape index: {}]   ;;  %s899_s1 = inlined_call_operand.vmem [shape: bf16[8,12], index: 1, kind: input, shape index: {}]   ;;  %s900_s2 = inlined_call_operand.vmem [shape: f32[8,1], index: 2, kind: input, shape index: {}]   ;;  %s901_s3 = inlined_call_operand.vmem [shape: bf16[8,24], index: 3, kind: input, shape index: {}]   ;;  %s902_s4 = inlined_call_operand.vmem [shape: f32[8,1], index: 4, kind: input, shape index: {}]   ;;  %s903_s5 = inlined_call_operand.vmem [shape: bf16[8,4], index: 5, kind: input, shape index: {}]   ;;  %s904_s6 = inlined_call_operand.vmem [shape: f32[8,1], index: 6, kind: input, shape index: {}]   ;;  %s905_s7 = inlined_call_operand.hbm [shape: bf16[2,8,16], index: 7, kind: output, shape index: {}]  }
   0x1   :  { %14 = vsyncpa [#allocation4 + $0x1], 0  ;;  %s776_s24 = smov 0   ;;  %s778_s25 = smov 0  }
   0x2   :  { %s780_s26 = smov 0   ;;  %s782_s27 = smov 0  }
   0x3 LB: > { %s797_s28 = sadd.s32 4294967295, %s726_s27   ;;  %s573_s29 = sadd.s32 4294967294, %s726_s27   ;;  %s726_s27 = sphi %s782_s27, %s911_s27   ;;  %s722_s26 = sphi %s780_s26, %s910_s26   ;;  %s718_s25 = sphi %s778_s25, %s909_s25   ;;  %s714_s24 = sphi %s776_s24, %s908_s24  }
   0x4   : > { %s801_s30 = sadd.s32 1, %s726_s27   ;;  %s179_s8 = sadd.s32 1, %s722_s26 }
   0x5   : > { %s176_s9 = ssub.s32 %s726_s27, %s801_s30  ;;  %p189_p0 = scmp.ne.s32.totalorder %s722_s26, %s718_s25 }
   0x6   : > { %p177_p1 = scmp.eq.s32.totalorder %s176_s9, 0  ;;  %p190_p2 = scmp.eq.s32.totalorder %s797_s28, 1 }
   0x7   : > { %p195_p3 = scmp.ne.s32.totalorder %s718_s25, %s714_s24  ;;  %p196_p4 = scmp.eq.s32.totalorder %s573_s29, 1 }
   0x8   : > { %s812_s10 = scalar_select %p177_p1, %s722_s26, %s179_s8  }
   0x9   : > { %p814_p5 = por %p190_p2, %p189_p0  ;;  %p818_p6 = por %p196_p4, %p195_p3 }
   0xa   : > { %p576_p7 = scmp.ge.s32.totalorder %s726_s27, 1  ;;  %p239_p8 = scmp.lt.s32.totalorder %s726_s27, 3 }
   0xc   : > { %p240_p9 = pnand %p576_p7, %p239_p8 }
   0xd   : > { %p270_p10 = scmp.lt.s32.totalorder (!%p240_p9), %s797_s28, 1  ;;  %s732_s20 = smov (!%p240_p9), 127  }
   0xe   : > { %243 = sbr.rel (%p240_p9) target bundleno = 815 (0x32f), region = 48  ;;  %s733_s21 = smov (!%p240_p9), 126  }
   0xf   : > { %s734_s9 = smov (!%p240_p9), 1   ;;  %s267_s19 = sand.u32 (!%p240_p9), 1, %s718_s25  }
  0x10   : > { %s735_s15 = smov (!%p240_p9), [#allocation3]  }
  0x11   : > { %s670_s16 = sshll.u32 (!%p240_p9), %s735_s15, 4  ;;  %s671_s16 = int_to_ptr.vmem [resolvable:$false] %s670_s16 }
  0x13   : > { %v281_v0 = vlaneseq  ;;  %v728_v1 = vmov 1983009808   ;;  %s271_s13 = scalar_select %p270_p10, %s797_s28, 1  ;;  %v729_v4 = vmov 0.0   ;;  %vm730_vm0 = vmmov 0   ;;  %v305_v10 = vld [vmem:[%s900_s2] sm:$0xff] }
  0x14   : > { %v279_v2 = vunpack.c.l.s4 %v728_v1  ;;  %596 = vmatprep.subr.bf16.mxu0 %v729_v4  ;;  %602 = vmatprep.subr.bf16.mxu1 %v729_v4  ;;  %v731_v12 = vmov 0   ;;  %vm297_vm1 = vcmask 1041408   ;;  %vm301_vm2 = vcmask 1043456   ;;  %v304_v20 = vld [vmem:[%s899_s1] sm:$0xf] }
  0x15   : > { %v282_v3 = vshrl.u32 %v281_v0, 7  ;;  %s578_s14 = sshll.u32 %s271_s13, 1  ;;  %598 = vmatprep.mubr.msk.bf16.mxu0 %vm730_vm0, %v729_v4  ;;  %606 = vmatprep.mubr.msk.bf16.mxu1 %vm730_vm0, %v729_v4  ;;  %vm315_vm3 = vcmask 1045504   ;;  %vm311_vm4 = vcmask 97280   ;;  %v439_v22 = vld [vmem:[%s903_s5] sm:$0xf] }
  0x16   : > { %v280_v5 = vunpack.c.0.s8 %v279_v2  ;;  %s273_s17 = scalar_lea.vmem %s898_s0, %s578_s14  ;;  %662 = vset.pattern.permute.xlu1 %v731_v12  ;;  %663 = vset.pattern.permute.xlu0 %v731_v12  ;;  %vm448_vm5 = vcmask 31744   ;;  %vm360_vm6 = vcmask 3072   ;;  %vm362_vm7 = vcmask 142472   ;;  %v440_v35 = vld [vmem:[%s904_s6] sm:$0xff]  ;;  %s501_s13 = scalar_lea.sflag [#allocation4], %s267_s19 }
  0x17   : > { %v275_v7 = vld [vmem:[%s273_s17] sm:$0x3]  ;;  %308 = vperm.xlu1 %662, %v305_v10   ;;  %361 = vst.msk [vmem:[#allocation2] sm:$0xf] %vm360_vm6, %v731_v12  ;;  %vm370_vm8 = vcmask 134152   ;;  %vm391_vm9 = vcmask 195584  }
  0x18   : > { %v283_v6 = vsub.s32 %v280_v5, %v282_v3  ;;  %v277_v8 = vcombine.low %v275_v7, %v275_v7  ;;  %363 = vst.msk [vmem:[#allocation2] sm:$0xf] %vm362_vm7, %v731_v12  ;;  %v385_v36 = vld [vmem:[%s902_s4] sm:$0xff]  ;;  %vm498_vm10 = vcmask 125952  }
  0x19   : > { %v384_v44 = vld [vmem:[%s901_s3] sm:$0xf] }
  0x1a   : > { %v291_v9 = vrot.slane %v275_v7, %v283_v6  ;;  %v284_v11 = vrot.slane %v277_v8, %v283_v6 }
  0x1c   : > { %292 = vrot.lane.b32.xlu0 %v284_v11, %s732_s20  ;;  %v294_v13 = vcombine.low %v291_v9, %v291_v9 }
  0x20   : > { %295 = vrot.lane.b32.xlu0 %v294_v13, %s733_s21 }
  0x8e   : > { %v293_v14 = vpop.permute.xlu0 %292 }
  0x8f   : > { %v300_v15 = vsel %vm297_vm1, %v275_v7, %v293_v14 }
  0x92   : > { %v296_v16 = vpop.permute.xlu0 %295  ;;  %v309_v23 = vpop.permute.xlu1 %308 }
  0x93   : > { %v303_v17 = vsel %vm301_vm2, %v300_v15, %v296_v16 }
  0x94   : > { %v316_v18 = vsel %vm315_vm3, %v303_v17, 0  ;;  %v447_v19 = vrot.slane %v303_v17, 2 }
  0x95   : > { %597 = vmatpush3.bf16.msra.mxu0 %v316_v18 }
  0x96   : > { %610 = vmatprep.subr.bf16.mxu0 %v729_v4  ;;  %v453_v21 = vsel %vm297_vm1, %v447_v19, 0 }
  0x98   : > { %599 = vmatmul.mubr.msk.bf16.vlgmr.msra.gmra.mxu0 %vm311_vm4, %v304_v20 }
  0x99   : > { %611 = vmatpush3.bf16.msra.mxu0 %v453_v21  ;;  %612 = vmatprep.mubr.msk.bf16.mxu0 %vm730_vm0, %v729_v4 }
  0xa0   : > { %613 = vmatmul.mubr.msk.bf16.vlgmr.msra.gmra.mxu0 %vm448_vm5, %v439_v22 }
 0x158   : > { %v352_v24 = vpop.f32.mrf.mxu0 }
 0x159   : > { %v353_v25 = vadd.f32 %v352_v24, %v309_v23 }
 0x15a   : > { %v600_v26 = vpop.f32.mrf.mxu0 }
 0x15b   : > { %v358_v27 = vmax.f32 %v353_v25, 0.0 }
 0x15c   : > { %v355_v28 = vpop.f32.mrf.mxu0 }
 0x15d   : > { %v588_v29 = vpack.c.bf16 %v358_v27, %v358_v27 }
 0x15e   : > { %v601_v30 = vpop.f32.mrf.mxu0 }
 0x15f   : > { %367 = vrot.lane.b32.xlu1 %v588_v29, %s734_s9 }
 0x160   : > { %v489_v34 = vpop.f32.mrf.mxu0 }
 0x162   : > { %v614_v37 = vpop.f32.mrf.mxu0 }
 0x164   : > { %v492_v38 = vpop.f32.mrf.mxu0 }
 0x166   : > { %v615_v39 = vpop.f32.mrf.mxu0 }
 0x1d1   : > { %v368_v31 = vpop.permute.xlu1 %367 }
 0x1d2   : > { %371 = vst.msk [vmem:[#allocation2] sm:$0xf] %vm370_vm8, %v368_v31 }
 0x1d9   : > { %v372_v32 = vld [vmem:[#allocation2] sm:$0xf] }
 0x1da   : > { %v581_v33 = vcombine.low %v372_v32, %v372_v32 }
 0x1dc   : > { %376 = vrot.lane.b32.xlu1 %v581_v33, %s732_s20  ;;  %378 = vrot.lane.b32.xlu0 %v581_v33, %s733_s21  ;;  %s577_s20 = sshll.u32 %s267_s19, 2  ;;  %s585_s21 = sshll.u32 %s797_s28, 6 }
 0x1dd   : > { %s269_s22 = scalar_lea.vmem [#allocation3], %s577_s20  ;;  %s512_s9 = scalar_lea.hbm %s905_s7, %s585_s21 }
 0x1de   : > { %s514_s23 = sshll.u32 %s269_s22, 4  ;;  %s672_s28 = scalar_lea.vmem %s671_s16, 128  ;;  %s515_s23 = int_to_ptr.vmem [resolvable:$true] %s514_s23 }
 0x1df   : > { %s666_s14 = scalar_lea.vmem %s515_s23, 64  ;;  %p673_p0 = scmp.lt.s32.totalorder %s515_s23, %s671_s16 }
 0x1e0   : > { %443 = vperm.xlu1 %662, %v440_v35   ;;  %388 = vperm.xlu0 %663, %v385_v36   ;;  %p667_p11 = scmp.ne.s32.totalorder %s515_s23, %s666_s14  ;;  %p674_p1 = scmp.lt.s32.totalorder %s672_s28, %s666_s14 }
 0x1e2   : > { %p668_p12 = pnand %p667_p11, %p814_p5  ;;  %p675_p2 = por %p674_p1, %p673_p0 }
 0x1e4   : > { %p669_p13 = pneg %p668_p12 }
 0x1e6   : > { %p676_p3 = pnand %p675_p2, %p669_p13 }
 0x24e   : > { %v379_v40 = vpop.permute.xlu0 %378  ;;  %v377_v42 = vpop.permute.xlu1 %376 }
 0x24f   : > { %v396_v41 = vsel %vm301_vm2, %v379_v40, 0  ;;  %v382_v43 = vsel %vm301_vm2, %v372_v32, %v377_v42 }
 0x250   : > { %603 = vmatpush3.bf16.msra.mxu1 %v396_v41 }
 0x251   : > { %604 = vmatprep.subr.bf16.mxu1 %v729_v4 }
 0x254   : > { %605 = vmatpush3.bf16.msra.mxu1 %v382_v43 }
 0x257   : > { %607 = vmatmul.mubr.msk.bf16.vlgmr.msra.gmra.mxu1 %vm391_vm9, %v384_v44 }
 0x25b   : > { %v389_v45 = vpop.permute.xlu0 %388  ;;  %v444_v46 = vpop.permute.xlu1 %443 }
 0x25c   : > { %v490_v50 = vadd.f32 %v489_v34, %v444_v46 }
 0x317   : > { %v432_v47 = vpop.f32.mrf.mxu1 }
 0x318   : > { %v433_v48 = vadd.f32 %v432_v47, %v389_v45 }
 0x319   : > { %v608_v49 = vpop.f32.mrf.mxu1 }
 0x31a   : > { %v438_v51 = vmax.f32 %v433_v48, 0.0 }
 0x31b   : > { %v435_v52 = vpop.f32.mrf.mxu1 }
 0x31c   : > { %v495_v53 = vadd.f32 %v490_v50, %v438_v51 }
 0x31d   : > { %v609_v54 = vpop.f32.mrf.mxu1 }
 0x31e   : > { %v496_v55 = vmax.f32 %v495_v53, 0.0 }
 0x320   : > { %v497_v56 = vpack.c.bf16 %v496_v55, %v496_v55 }
 0x322   : > { %499 = vst.msk [vmem:[%s269_s22] sm:$0xf] %vm498_vm10, %v497_v56 }
 0x323   : > { %679 = shalt.err (!%p676_p3)
}
 0x324   : > { %s680_s17 = scalar_lea.hbm %s512_s9, 64  ;;  %s684_s20 = scalar_lea.hbm %s905_s7, 128 }
 0x325   : > { %p681_p4 = scmp.ne.s32.totalorder %s512_s9, %s680_s17  ;;  %p685_p9 = scmp.lt.s32.totalorder %s512_s9, %s905_s7 }
 0x326   : > { %p686_p10 = scmp.lt.s32.totalorder %s684_s20, %s680_s17 }
 0x327   : > { %p682_p7 = pnand %p681_p4, %p814_p5 }
 0x328   : > { %p687_p11 = por %p686_p10, %p685_p9 }
 0x329   : > { %p683_p8 = pneg %p682_p7 }
 0x32b   : > { %p688_p12 = pnand %p687_p11, %p683_p8 }
 0x32d   : > { %691 = shalt.err (!%p688_p12)
}
 0x32e   : > { %616 = dma.vmem_to_hbm [thread:$0]  (%p814_p5), %s515_s23, 64, %s512_s9, %s501_s13  }
 0x32f PF: > { %p622_p13 = scmp.ge.s32.totalorder %s726_s27, 2  ;;  %s526_s29 = sand.u32 1, %s714_s24  }
 0x330   : > { %s527_s8 = scalar_lea.sflag [#allocation4], %s526_s29 }
 0x331   : > { %p619_p0 = pnand %p622_p13, %p818_p6 }
 0x333   : > { %p620_p1 = pneg %p619_p0 }
 0x335   : > { %709 = dma.done.wait (%p620_p1), %s527_s8, 64  }
 0x336   : > { %711 = vsyncadd (%p620_p1), %s527_s8, 4294967232  ;;  %p17_p2 = scmp.ge.s32.totalorder %s801_s30, 4   ;;  %s908_s24 = smov %s718_s25 }
 0x337   : > { %s909_s25 = smov %s722_s26  ;;  %s910_s26 = smov %s812_s10 }
 0x338   : > { %s911_s27 = smov %s801_s30  ;;  %19 = sbr.rel (!%p17_p2) target bundleno = 3 (0x3), region = 83 }
 0x33d   :  { %532 = vsyncpa [#allocation4], 1 }
 0x33e   :  { %534 = vsyncpa [#allocation4 + $0x1], 1 }

</bundles_post_ra>
